<compile_context>
chip_gen: v5e
topology: v5e:2x2
jax: 0.10.0
libtpu: 0.0.40
codegen_flags: <defaults>
</compile_context>

<pallas_src>
import jax
import jax.numpy as jnp
from jax import lax
from jax.experimental import pallas as pl
from jax.experimental.pallas import tpu as pltpu


def _price_lstm_kernel(x_ref, wih_ref, whh_ref, b_ref, wlin_ref, blin_ref,
                       out_ref):
    B = out_ref.shape[0]
    H = whh_ref.shape[0]
    TB = x_ref.shape[0]
    T = TB // B

    # Hoisted input projection for every time step in one batched matmul:
    # (T*B, I) @ (I, 4H) + b.  Kept as a value (4 vregs at toy shapes) so the
    # recurrent loop never touches VMEM for it.
    x_bf = x_ref[...].astype(jnp.bfloat16)
    wih_bf = wih_ref[...].astype(jnp.bfloat16)
    gx = (jnp.dot(x_bf, wih_bf, preferred_element_type=jnp.float32)
          + b_ref[...])                                    # (T*B, 4H) f32

    whh_bf = whh_ref[...].astype(jnp.bfloat16)             # (H, 4H) resident

    h = jnp.zeros((B, H), jnp.float32)
    c = jnp.zeros((B, H), jnp.float32)

    # T is small and static: full static unroll, static slices of gx.
    for t in range(T):
        # Only one serially-dependent matmul per step (bf16 in, f32 acc).
        gates = (gx[t * B:(t + 1) * B, :]
                 + jnp.dot(h.astype(jnp.bfloat16), whh_bf,
                           preferred_element_type=jnp.float32))   # (B, 4H)

        # One sigmoid and one tanh over the full 128-lane tile (EUP cost is the
        # same whether 32 or 128 lanes are live), then slice the gate columns.
        sig = jax.nn.sigmoid(gates)
        tnh = jnp.tanh(gates)
        i_g = sig[:, 0 * H:1 * H]
        f_g = sig[:, 1 * H:2 * H]
        g_g = tnh[:, 2 * H:3 * H]
        o_g = sig[:, 3 * H:4 * H]

        c = f_g * c + i_g * g_g
        h = o_g * jnp.tanh(c)

    # Linear head on the last hidden state, kept in f32 (written exactly once).
    out = (jnp.dot(h, wlin_ref[...], preferred_element_type=jnp.float32)
           + blin_ref[...])
    out_ref[...] = out.astype(out_ref.dtype)


def price_lstm_forward(x, w_ih, w_hh, b_ih, b_hh, w_lin, b_lin):
    """x: [B, T, I] float32 (batch_first). Returns [B, O] float32.

    Weight shapes follow torch.nn.LSTM / nn.Linear:
      w_ih: (4H, I), w_hh: (4H, H), b_ih/b_hh: (4H,), w_lin: (O, H), b_lin: (O,)
    """
    B, T, I = x.shape
    H = w_hh.shape[1]          # torch w_hh is (4H, H)
    O = w_lin.shape[0]

    # Time-major flattening so step t is a contiguous (B, 4H) row block.
    x_tb = jnp.asarray(x, jnp.float32).transpose(1, 0, 2).reshape(T * B, I)

    # Transpose weights for right-multiplication inside the kernel.
    wih_t = jnp.asarray(w_ih, jnp.float32).T               # (I, 4H)
    whh_t = jnp.asarray(w_hh, jnp.float32).T               # (H, 4H)
    b = (jnp.asarray(b_ih, jnp.float32)
         + jnp.asarray(b_hh, jnp.float32)).reshape(1, 4 * H)
    wlin_t = jnp.asarray(w_lin, jnp.float32).T              # (H, O)
    blin = jnp.asarray(b_lin, jnp.float32).reshape(1, O)

    grid_spec = pltpu.PrefetchScalarGridSpec(
        num_scalar_prefetch=0,
        grid=(1,),                                           # single invocation
        in_specs=[
            pl.BlockSpec((T * B, I), lambda i: (0, 0)),      # x (time-major flat)
            pl.BlockSpec((I, 4 * H), lambda i: (0, 0)),      # W_ih^T
            pl.BlockSpec((H, 4 * H), lambda i: (0, 0)),      # W_hh^T
            pl.BlockSpec((1, 4 * H), lambda i: (0, 0)),      # combined bias
            pl.BlockSpec((H, O), lambda i: (0, 0)),          # W_lin^T
            pl.BlockSpec((1, O), lambda i: (0, 0)),          # b_lin
        ],
        out_specs=pl.BlockSpec((B, O), lambda i: (0, 0)),
    )

    return pl.pallas_call(
        _price_lstm_kernel,
        out_shape=jax.ShapeDtypeStruct((B, O), jnp.float32),
        grid_spec=grid_spec,
        compiler_params=pltpu.CompilerParams(
            dimension_semantics=("arbitrary",)),
    )(x_tb, wih_t, whh_t, b, wlin_t, blin)


def _reference_forward(x, w_ih, w_hh, b_ih, b_hh, w_lin, b_lin):
    """Pure-JAX f32 reference matching torch.nn.LSTM + Linear semantics."""
    B, T, I = x.shape
    H = w_hh.shape[1]

    def step(carry, x_t):
        h, c = carry
        gates = x_t @ w_ih.T + h @ w_hh.T + b_ih + b_hh
        i_g = jax.nn.sigmoid(gates[:, 0 * H:1 * H])
        f_g = jax.nn.sigmoid(gates[:, 1 * H:2 * H])
        g_g = jnp.tanh(gates[:, 2 * H:3 * H])
        o_g = jax.nn.sigmoid(gates[:, 3 * H:4 * H])
        c_new = f_g * c + i_g * g_g
        h_new = o_g * jnp.tanh(c_new)
        return (h_new, c_new), None

    h0 = jnp.zeros((B, H), jnp.float32)
    c0 = jnp.zeros((B, H), jnp.float32)
    (h_last, _), _ = lax.scan(step, (h0, c0), jnp.swapaxes(x, 0, 1))
    return h_last @ w_lin.T + b_lin


if __name__ == "__main__":
    # Small shapes consistent with PriceLSTM: input_size=I, hidden_size=H,
    # output_size=1, lookback (seq len) = T.
    B, T, I, H, O = 4, 8, 16, 32, 1

    key = jax.random.PRNGKey(0)
    ks = jax.random.split(key, 8)
    scale = 1.0 / jnp.sqrt(jnp.float32(H))  # PyTorch-style uniform init bound

    x = jax.random.normal(ks[0], (B, T, I), jnp.float32)
    w_ih = jax.random.uniform(ks[1], (4 * H, I), jnp.float32, -scale, scale)
    w_hh = jax.random.uniform(ks[2], (4 * H, H), jnp.float32, -scale, scale)
    b_ih = jax.random.uniform(ks[3], (4 * H,), jnp.float32, -scale, scale)
    b_hh = jax.random.uniform(ks[4], (4 * H,), jnp.float32, -scale, scale)
    w_lin = jax.random.uniform(ks[5], (O, H), jnp.float32, -scale, scale)
    b_lin = jax.random.uniform(ks[6], (O,), jnp.float32, -scale, scale)

    out = price_lstm_forward(x, w_ih, w_hh, b_ih, b_hh, w_lin, b_lin)
    out = jax.block_until_ready(out)

    ref = _reference_forward(x, w_ih, w_hh, b_ih, b_hh, w_lin, b_lin)
    assert out.shape == (B, O)
    # bf16 MXU operands inside the kernel (f32 accumulation / f32 head), so the
    # tolerance vs. the f32 reference is relaxed per the perf review.
    assert jnp.allclose(out, ref, atol=2e-2, rtol=2e-2), (out, ref)

    print("KERNEL_OK")
</pallas_src>

<mosaic_0001>
module attributes {stable_mosaic.version = 11 : i64} {
  func.func @_price_lstm_kernel(%arg0: i32, %arg1: memref<32x16xf32, #tpu.memory_space<vmem>>, %arg2: memref<16x128xf32, #tpu.memory_space<vmem>>, %arg3: memref<32x128xf32, #tpu.memory_space<vmem>>, %arg4: memref<1x128xf32, #tpu.memory_space<vmem>>, %arg5: memref<32x1xf32, #tpu.memory_space<vmem>>, %arg6: memref<1x1xf32, #tpu.memory_space<vmem>>, %arg7: memref<4x1xf32, #tpu.memory_space<vmem>>) attributes {dimension_semantics = [#tpu.dimension_semantics<arbitrary>], iteration_bounds = array<i64: 1>, scalar_prefetch = 0 : i64, scratch_operands = 0 : i64, tpu.core_type = #tpu.core_type<tc>, window_params = [{pipeline_mode = #tpu.pipeline_mode<synchronous>, transform_indices = @transform_0, window_bounds = array<i64: 32, 16>}, {pipeline_mode = #tpu.pipeline_mode<synchronous>, transform_indices = @transform_1, window_bounds = array<i64: 16, 128>}, {pipeline_mode = #tpu.pipeline_mode<synchronous>, transform_indices = @transform_2, window_bounds = array<i64: 32, 128>}, {pipeline_mode = #tpu.pipeline_mode<synchronous>, transform_indices = @transform_3, window_bounds = array<i64: 1, 128>}, {pipeline_mode = #tpu.pipeline_mode<synchronous>, transform_indices = @transform_4, window_bounds = array<i64: 32, 1>}, {pipeline_mode = #tpu.pipeline_mode<synchronous>, transform_indices = @transform_5, window_bounds = array<i64: 1, 1>}, {pipeline_mode = #tpu.pipeline_mode<synchronous>, transform_indices = @transform_6, window_bounds = array<i64: 4, 1>}]} {
    %c0 = arith.constant 0 : index
    %c0_0 = arith.constant 0 : index
    %0 = vector.load %arg1[%c0, %c0_0] : memref<32x16xf32, #tpu.memory_space<vmem>>, vector<32x16xf32>
    %1 = arith.truncf %0 : vector<32x16xf32> to vector<32x16xbf16>
    %c0_1 = arith.constant 0 : index
    %c0_2 = arith.constant 0 : index
    %2 = vector.load %arg2[%c0_1, %c0_2] : memref<16x128xf32, #tpu.memory_space<vmem>>, vector<16x128xf32>
    %3 = arith.truncf %2 : vector<16x128xf32> to vector<16x128xbf16>
    %cst = arith.constant dense<0.000000e+00> : vector<32x128xf32>
    %4 = tpu.matmul %1, %3, %cst {dimension_numbers = #tpu.dot_dimension_numbers<[1], [0], [0], [1], [0, 0, 1, 1], [], []>} : vector<32x16xbf16>, vector<16x128xbf16>, vector<32x128xf32> -> vector<32x128xf32>
    %c0_3 = arith.constant 0 : index
    %c0_4 = arith.constant 0 : index
    %5 = vector.load %arg4[%c0_3, %c0_4] : memref<1x128xf32, #tpu.memory_space<vmem>>, vector<1x128xf32>
    %6 = vector.broadcast %5 : vector<1x128xf32> to vector<32x128xf32>
    %7 = arith.addf %4, %6 : vector<32x128xf32>
    %c0_5 = arith.constant 0 : index
    %c0_6 = arith.constant 0 : index
    %8 = vector.load %arg3[%c0_5, %c0_6] : memref<32x128xf32, #tpu.memory_space<vmem>>, vector<32x128xf32>
    %9 = arith.truncf %8 : vector<32x128xf32> to vector<32x128xbf16>
    %cst_7 = arith.constant 0.000000e+00 : f32
    %10 = vector.broadcast %cst_7 : f32 to vector<4x32xf32>
    %cst_8 = arith.constant 0.000000e+00 : f32
    %11 = vector.broadcast %cst_8 : f32 to vector<4x32xf32>
    %12 = vector.extract_strided_slice %7 {offsets = [0, 0], sizes = [4, 128], strides = [1, 1]} : vector<32x128xf32> to vector<4x128xf32>
    %13 = arith.truncf %10 : vector<4x32xf32> to vector<4x32xbf16>
    %cst_9 = arith.constant dense<0.000000e+00> : vector<4x128xf32>
    %14 = tpu.matmul %13, %9, %cst_9 {dimension_numbers = #tpu.dot_dimension_numbers<[1], [0], [0], [1], [0, 0, 1, 1], [], []>} : vector<4x32xbf16>, vector<32x128xbf16>, vector<4x128xf32> -> vector<4x128xf32>
    %15 = arith.addf %12, %14 : vector<4x128xf32>
    %16 = arith.negf %15 : vector<4x128xf32>
    %17 = math.exp %16 : vector<4x128xf32>
    %cst_10 = arith.constant 1.000000e+00 : f32
    %18 = vector.broadcast %cst_10 : f32 to vector<4x128xf32>
    %19 = arith.addf %18, %17 : vector<4x128xf32>
    %20 = arith.divf %18, %19 : vector<4x128xf32>
    %21 = math.tanh %15 : vector<4x128xf32>
    %22 = vector.extract_strided_slice %20 {offsets = [0, 0], sizes = [4, 32], strides = [1, 1]} : vector<4x128xf32> to vector<4x32xf32>
    %23 = vector.extract_strided_slice %20 {offsets = [0, 32], sizes = [4, 32], strides = [1, 1]} : vector<4x128xf32> to vector<4x32xf32>
    %24 = vector.extract_strided_slice %21 {offsets = [0, 64], sizes = [4, 32], strides = [1, 1]} : vector<4x128xf32> to vector<4x32xf32>
    %25 = vector.extract_strided_slice %20 {offsets = [0, 96], sizes = [4, 32], strides = [1, 1]} : vector<4x128xf32> to vector<4x32xf32>
    %26 = arith.mulf %23, %11 : vector<4x32xf32>
    %27 = arith.mulf %22, %24 : vector<4x32xf32>
    %28 = arith.addf %26, %27 : vector<4x32xf32>
    %29 = math.tanh %28 : vector<4x32xf32>
    %30 = arith.mulf %25, %29 : vector<4x32xf32>
    %31 = vector.extract_strided_slice %7 {offsets = [4, 0], sizes = [4, 128], strides = [1, 1]} : vector<32x128xf32> to vector<4x128xf32>
    %32 = arith.truncf %30 : vector<4x32xf32> to vector<4x32xbf16>
    %cst_11 = arith.constant dense<0.000000e+00> : vector<4x128xf32>
    %33 = tpu.matmul %32, %9, %cst_11 {dimension_numbers = #tpu.dot_dimension_numbers<[1], [0], [0], [1], [0, 0, 1, 1], [], []>} : vector<4x32xbf16>, vector<32x128xbf16>, vector<4x128xf32> -> vector<4x128xf32>
    %34 = arith.addf %31, %33 : vector<4x128xf32>
    %35 = arith.negf %34 : vector<4x128xf32>
    %36 = math.exp %35 : vector<4x128xf32>
    %cst_12 = arith.constant 1.000000e+00 : f32
    %37 = vector.broadcast %cst_12 : f32 to vector<4x128xf32>
    %38 = arith.addf %37, %36 : vector<4x128xf32>
    %39 = arith.divf %37, %38 : vector<4x128xf32>
    %40 = math.tanh %34 : vector<4x128xf32>
    %41 = vector.extract_strided_slice %39 {offsets = [0, 0], sizes = [4, 32], strides = [1, 1]} : vector<4x128xf32> to vector<4x32xf32>
    %42 = vector.extract_strided_slice %39 {offsets = [0, 32], sizes = [4, 32], strides = [1, 1]} : vector<4x128xf32> to vector<4x32xf32>
    %43 = vector.extract_strided_slice %40 {offsets = [0, 64], sizes = [4, 32], strides = [1, 1]} : vector<4x128xf32> to vector<4x32xf32>
    %44 = vector.extract_strided_slice %39 {offsets = [0, 96], sizes = [4, 32], strides = [1, 1]} : vector<4x128xf32> to vector<4x32xf32>
    %45 = arith.mulf %42, %28 : vector<4x32xf32>
    %46 = arith.mulf %41, %43 : vector<4x32xf32>
    %47 = arith.addf %45, %46 : vector<4x32xf32>
    %48 = math.tanh %47 : vector<4x32xf32>
    %49 = arith.mulf %44, %48 : vector<4x32xf32>
    %50 = vector.extract_strided_slice %7 {offsets = [8, 0], sizes = [4, 128], strides = [1, 1]} : vector<32x128xf32> to vector<4x128xf32>
    %51 = arith.truncf %49 : vector<4x32xf32> to vector<4x32xbf16>
    %cst_13 = arith.constant dense<0.000000e+00> : vector<4x128xf32>
    %52 = tpu.matmul %51, %9, %cst_13 {dimension_numbers = #tpu.dot_dimension_numbers<[1], [0], [0], [1], [0, 0, 1, 1], [], []>} : vector<4x32xbf16>, vector<32x128xbf16>, vector<4x128xf32> -> vector<4x128xf32>
    %53 = arith.addf %50, %52 : vector<4x128xf32>
    %54 = arith.negf %53 : vector<4x128xf32>
    %55 = math.exp %54 : vector<4x128xf32>
    %cst_14 = arith.constant 1.000000e+00 : f32
    %56 = vector.broadcast %cst_14 : f32 to vector<4x128xf32>
    %57 = arith.addf %56, %55 : vector<4x128xf32>
    %58 = arith.divf %56, %57 : vector<4x128xf32>
    %59 = math.tanh %53 : vector<4x128xf32>
    %60 = vector.extract_strided_slice %58 {offsets = [0, 0], sizes = [4, 32], strides = [1, 1]} : vector<4x128xf32> to vector<4x32xf32>
    %61 = vector.extract_strided_slice %58 {offsets = [0, 32], sizes = [4, 32], strides = [1, 1]} : vector<4x128xf32> to vector<4x32xf32>
    %62 = vector.extract_strided_slice %59 {offsets = [0, 64], sizes = [4, 32], strides = [1, 1]} : vector<4x128xf32> to vector<4x32xf32>
    %63 = vector.extract_strided_slice %58 {offsets = [0, 96], sizes = [4, 32], strides = [1, 1]} : vector<4x128xf32> to vector<4x32xf32>
    %64 = arith.mulf %61, %47 : vector<4x32xf32>
    %65 = arith.mulf %60, %62 : vector<4x32xf32>
    %66 = arith.addf %64, %65 : vector<4x32xf32>
    %67 = math.tanh %66 : vector<4x32xf32>
    %68 = arith.mulf %63, %67 : vector<4x32xf32>
    %69 = vector.extract_strided_slice %7 {offsets = [12, 0], sizes = [4, 128], strides = [1, 1]} : vector<32x128xf32> to vector<4x128xf32>
    %70 = arith.truncf %68 : vector<4x32xf32> to vector<4x32xbf16>
    %cst_15 = arith.constant dense<0.000000e+00> : vector<4x128xf32>
    %71 = tpu.matmul %70, %9, %cst_15 {dimension_numbers = #tpu.dot_dimension_numbers<[1], [0], [0], [1], [0, 0, 1, 1], [], []>} : vector<4x32xbf16>, vector<32x128xbf16>, vector<4x128xf32> -> vector<4x128xf32>
    %72 = arith.addf %69, %71 : vector<4x128xf32>
    %73 = arith.negf %72 : vector<4x128xf32>
    %74 = math.exp %73 : vector<4x128xf32>
    %cst_16 = arith.constant 1.000000e+00 : f32
    %75 = vector.broadcast %cst_16 : f32 to vector<4x128xf32>
    %76 = arith.addf %75, %74 : vector<4x128xf32>
    %77 = arith.divf %75, %76 : vector<4x128xf32>
    %78 = math.tanh %72 : vector<4x128xf32>
    %79 = vector.extract_strided_slice %77 {offsets = [0, 0], sizes = [4, 32], strides = [1, 1]} : vector<4x128xf32> to vector<4x32xf32>
    %80 = vector.extract_strided_slice %77 {offsets = [0, 32], sizes = [4, 32], strides = [1, 1]} : vector<4x128xf32> to vector<4x32xf32>
    %81 = vector.extract_strided_slice %78 {offsets = [0, 64], sizes = [4, 32], strides = [1, 1]} : vector<4x128xf32> to vector<4x32xf32>
    %82 = vector.extract_strided_slice %77 {offsets = [0, 96], sizes = [4, 32], strides = [1, 1]} : vector<4x128xf32> to vector<4x32xf32>
    %83 = arith.mulf %80, %66 : vector<4x32xf32>
    %84 = arith.mulf %79, %81 : vector<4x32xf32>
    %85 = arith.addf %83, %84 : vector<4x32xf32>
    %86 = math.tanh %85 : vector<4x32xf32>
    %87 = arith.mulf %82, %86 : vector<4x32xf32>
    %88 = vector.extract_strided_slice %7 {offsets = [16, 0], sizes = [4, 128], strides = [1, 1]} : vector<32x128xf32> to vector<4x128xf32>
    %89 = arith.truncf %87 : vector<4x32xf32> to vector<4x32xbf16>
    %cst_17 = arith.constant dense<0.000000e+00> : vector<4x128xf32>
    %90 = tpu.matmul %89, %9, %cst_17 {dimension_numbers = #tpu.dot_dimension_numbers<[1], [0], [0], [1], [0, 0, 1, 1], [], []>} : vector<4x32xbf16>, vector<32x128xbf16>, vector<4x128xf32> -> vector<4x128xf32>
    %91 = arith.addf %88, %90 : vector<4x128xf32>
    %92 = arith.negf %91 : vector<4x128xf32>
    %93 = math.exp %92 : vector<4x128xf32>
    %cst_18 = arith.constant 1.000000e+00 : f32
    %94 = vector.broadcast %cst_18 : f32 to vector<4x128xf32>
    %95 = arith.addf %94, %93 : vector<4x128xf32>
    %96 = arith.divf %94, %95 : vector<4x128xf32>
    %97 = math.tanh %91 : vector<4x128xf32>
    %98 = vector.extract_strided_slice %96 {offsets = [0, 0], sizes = [4, 32], strides = [1, 1]} : vector<4x128xf32> to vector<4x32xf32>
    %99 = vector.extract_strided_slice %96 {offsets = [0, 32], sizes = [4, 32], strides = [1, 1]} : vector<4x128xf32> to vector<4x32xf32>
    %100 = vector.extract_strided_slice %97 {offsets = [0, 64], sizes = [4, 32], strides = [1, 1]} : vector<4x128xf32> to vector<4x32xf32>
    %101 = vector.extract_strided_slice %96 {offsets = [0, 96], sizes = [4, 32], strides = [1, 1]} : vector<4x128xf32> to vector<4x32xf32>
    %102 = arith.mulf %99, %85 : vector<4x32xf32>
    %103 = arith.mulf %98, %100 : vector<4x32xf32>
    %104 = arith.addf %102, %103 : vector<4x32xf32>
    %105 = math.tanh %104 : vector<4x32xf32>
    %106 = arith.mulf %101, %105 : vector<4x32xf32>
    %107 = vector.extract_strided_slice %7 {offsets = [20, 0], sizes = [4, 128], strides = [1, 1]} : vector<32x128xf32> to vector<4x128xf32>
    %108 = arith.truncf %106 : vector<4x32xf32> to vector<4x32xbf16>
    %cst_19 = arith.constant dense<0.000000e+00> : vector<4x128xf32>
    %109 = tpu.matmul %108, %9, %cst_19 {dimension_numbers = #tpu.dot_dimension_numbers<[1], [0], [0], [1], [0, 0, 1, 1], [], []>} : vector<4x32xbf16>, vector<32x128xbf16>, vector<4x128xf32> -> vector<4x128xf32>
    %110 = arith.addf %107, %109 : vector<4x128xf32>
    %111 = arith.negf %110 : vector<4x128xf32>
    %112 = math.exp %111 : vector<4x128xf32>
    %cst_20 = arith.constant 1.000000e+00 : f32
    %113 = vector.broadcast %cst_20 : f32 to vector<4x128xf32>
    %114 = arith.addf %113, %112 : vector<4x128xf32>
    %115 = arith.divf %113, %114 : vector<4x128xf32>
    %116 = math.tanh %110 : vector<4x128xf32>
    %117 = vector.extract_strided_slice %115 {offsets = [0, 0], sizes = [4, 32], strides = [1, 1]} : vector<4x128xf32> to vector<4x32xf32>
    %118 = vector.extract_strided_slice %115 {offsets = [0, 32], sizes = [4, 32], strides = [1, 1]} : vector<4x128xf32> to vector<4x32xf32>
    %119 = vector.extract_strided_slice %116 {offsets = [0, 64], sizes = [4, 32], strides = [1, 1]} : vector<4x128xf32> to vector<4x32xf32>
    %120 = vector.extract_strided_slice %115 {offsets = [0, 96], sizes = [4, 32], strides = [1, 1]} : vector<4x128xf32> to vector<4x32xf32>
    %121 = arith.mulf %118, %104 : vector<4x32xf32>
    %122 = arith.mulf %117, %119 : vector<4x32xf32>
    %123 = arith.addf %121, %122 : vector<4x32xf32>
    %124 = math.tanh %123 : vector<4x32xf32>
    %125 = arith.mulf %120, %124 : vector<4x32xf32>
    %126 = vector.extract_strided_slice %7 {offsets = [24, 0], sizes = [4, 128], strides = [1, 1]} : vector<32x128xf32> to vector<4x128xf32>
    %127 = arith.truncf %125 : vector<4x32xf32> to vector<4x32xbf16>
    %cst_21 = arith.constant dense<0.000000e+00> : vector<4x128xf32>
    %128 = tpu.matmul %127, %9, %cst_21 {dimension_numbers = #tpu.dot_dimension_numbers<[1], [0], [0], [1], [0, 0, 1, 1], [], []>} : vector<4x32xbf16>, vector<32x128xbf16>, vector<4x128xf32> -> vector<4x128xf32>
    %129 = arith.addf %126, %128 : vector<4x128xf32>
    %130 = arith.negf %129 : vector<4x128xf32>
    %131 = math.exp %130 : vector<4x128xf32>
    %cst_22 = arith.constant 1.000000e+00 : f32
    %132 = vector.broadcast %cst_22 : f32 to vector<4x128xf32>
    %133 = arith.addf %132, %131 : vector<4x128xf32>
    %134 = arith.divf %132, %133 : vector<4x128xf32>
    %135 = math.tanh %129 : vector<4x128xf32>
    %136 = vector.extract_strided_slice %134 {offsets = [0, 0], sizes = [4, 32], strides = [1, 1]} : vector<4x128xf32> to vector<4x32xf32>
    %137 = vector.extract_strided_slice %134 {offsets = [0, 32], sizes = [4, 32], strides = [1, 1]} : vector<4x128xf32> to vector<4x32xf32>
    %138 = vector.extract_strided_slice %135 {offsets = [0, 64], sizes = [4, 32], strides = [1, 1]} : vector<4x128xf32> to vector<4x32xf32>
    %139 = vector.extract_strided_slice %134 {offsets = [0, 96], sizes = [4, 32], strides = [1, 1]} : vector<4x128xf32> to vector<4x32xf32>
    %140 = arith.mulf %137, %123 : vector<4x32xf32>
    %141 = arith.mulf %136, %138 : vector<4x32xf32>
    %142 = arith.addf %140, %141 : vector<4x32xf32>
    %143 = math.tanh %142 : vector<4x32xf32>
    %144 = arith.mulf %139, %143 : vector<4x32xf32>
    %145 = vector.extract_strided_slice %7 {offsets = [28, 0], sizes = [4, 128], strides = [1, 1]} : vector<32x128xf32> to vector<4x128xf32>
    %146 = arith.truncf %144 : vector<4x32xf32> to vector<4x32xbf16>
    %cst_23 = arith.constant dense<0.000000e+00> : vector<4x128xf32>
    %147 = tpu.matmul %146, %9, %cst_23 {dimension_numbers = #tpu.dot_dimension_numbers<[1], [0], [0], [1], [0, 0, 1, 1], [], []>} : vector<4x32xbf16>, vector<32x128xbf16>, vector<4x128xf32> -> vector<4x128xf32>
    %148 = arith.addf %145, %147 : vector<4x128xf32>
    %149 = arith.negf %148 : vector<4x128xf32>
    %150 = math.exp %149 : vector<4x128xf32>
    %cst_24 = arith.constant 1.000000e+00 : f32
    %151 = vector.broadcast %cst_24 : f32 to vector<4x128xf32>
    %152 = arith.addf %151, %150 : vector<4x128xf32>
    %153 = arith.divf %151, %152 : vector<4x128xf32>
    %154 = math.tanh %148 : vector<4x128xf32>
    %155 = vector.extract_strided_slice %153 {offsets = [0, 0], sizes = [4, 32], strides = [1, 1]} : vector<4x128xf32> to vector<4x32xf32>
    %156 = vector.extract_strided_slice %153 {offsets = [0, 32], sizes = [4, 32], strides = [1, 1]} : vector<4x128xf32> to vector<4x32xf32>
    %157 = vector.extract_strided_slice %154 {offsets = [0, 64], sizes = [4, 32], strides = [1, 1]} : vector<4x128xf32> to vector<4x32xf32>
    %158 = vector.extract_strided_slice %153 {offsets = [0, 96], sizes = [4, 32], strides = [1, 1]} : vector<4x128xf32> to vector<4x32xf32>
    %159 = arith.mulf %156, %142 : vector<4x32xf32>
    %160 = arith.mulf %155, %157 : vector<4x32xf32>
    %161 = arith.addf %159, %160 : vector<4x32xf32>
    %162 = math.tanh %161 : vector<4x32xf32>
    %163 = arith.mulf %158, %162 : vector<4x32xf32>
    %c0_25 = arith.constant 0 : index
    %c0_26 = arith.constant 0 : index
    %164 = vector.load %arg5[%c0_25, %c0_26] : memref<32x1xf32, #tpu.memory_space<vmem>>, vector<32x1xf32>
    %cst_27 = arith.constant dense<0.000000e+00> : vector<4x1xf32>
    %165 = tpu.matmul %163, %164, %cst_27 {dimension_numbers = #tpu.dot_dimension_numbers<[1], [0], [0], [1], [0, 0, 1, 1], [], []>} : vector<4x32xf32>, vector<32x1xf32>, vector<4x1xf32> -> vector<4x1xf32>
    %c0_28 = arith.constant 0 : index
    %c0_29 = arith.constant 0 : index
    %166 = vector.load %arg6[%c0_28, %c0_29] : memref<1x1xf32, #tpu.memory_space<vmem>>, vector<1x1xf32>
    %167 = vector.broadcast %166 : vector<1x1xf32> to vector<4x1xf32>
    %168 = arith.addf %165, %167 : vector<4x1xf32>
    %c0_30 = arith.constant 0 : index
    %c0_31 = arith.constant 0 : index
    %169 = vector.load %arg7[%c0_30, %c0_31] : memref<4x1xf32, #tpu.memory_space<vmem>>, vector<4x1xf32>
    tpu.vector_store %arg7[%c0_30, %c0_31], %168 {strides = array<i32>} : memref<4x1xf32, #tpu.memory_space<vmem>>, vector<4x1xf32>,
    return
  }
  func.func @transform_0(%arg0: i32) -> (i32, i32) {
    %c0_i32 = arith.constant 0 : i32
    %c0_i32_0 = arith.constant 0 : i32
    %c0_i32_1 = arith.constant 0 : i32
    return %c0_i32, %c0_i32_0 : i32, i32
  }
  func.func @transform_1(%arg0: i32) -> (i32, i32) {
    %c0_i32 = arith.constant 0 : i32
    %c0_i32_0 = arith.constant 0 : i32
    %c0_i32_1 = arith.constant 0 : i32
    return %c0_i32, %c0_i32_0 : i32, i32
  }
  func.func @transform_2(%arg0: i32) -> (i32, i32) {
    %c0_i32 = arith.constant 0 : i32
    %c0_i32_0 = arith.constant 0 : i32
    %c0_i32_1 = arith.constant 0 : i32
    return %c0_i32, %c0_i32_0 : i32, i32
  }
  func.func @transform_3(%arg0: i32) -> (i32, i32) {
    %c0_i32 = arith.constant 0 : i32
    %c0_i32_0 = arith.constant 0 : i32
    %c0_i32_1 = arith.constant 0 : i32
    return %c0_i32, %c0_i32_0 : i32, i32
  }
  func.func @transform_4(%arg0: i32) -> (i32, i32) {
    %c0_i32 = arith.constant 0 : i32
    %c0_i32_0 = arith.constant 0 : i32
    %c0_i32_1 = arith.constant 0 : i32
    return %c0_i32, %c0_i32_0 : i32, i32
  }
  func.func @transform_5(%arg0: i32) -> (i32, i32) {
    %c0_i32 = arith.constant 0 : i32
    %c0_i32_0 = arith.constant 0 : i32
    %c0_i32_1 = arith.constant 0 : i32
    return %c0_i32, %c0_i32_0 : i32, i32
  }
  func.func @transform_6(%arg0: i32) -> (i32, i32) {
    %c0_i32 = arith.constant 0 : i32
    %c0_i32_0 = arith.constant 0 : i32
    %c0_i32_1 = arith.constant 0 : i32
    return %c0_i32, %c0_i32_0 : i32, i32
  }
}

</mosaic_0001>

<bundles_post_ra>
// kernel: tpu_custom_call.1
= control target key start
LH: loop header
LB: loop body
LE: loop exit
PB: predicated region body
PF: predicated region fallthrough
CT: control target
= control target key end

     0   :  { %vm39_vm0 = vcmask 130048   ;;  %v695_v12 = vmov 0   ;;  %s696_s13 = smov 64   ;;  %vm71_vm5 = vcmask 261120   ;;  %s832_s1 = inlined_call_operand.vmem [shape: f32[16,128], index: 1, kind: input, shape index: {}]   ;;  %s833_s2 = inlined_call_operand.vmem [shape: f32[32,128], index: 2, kind: input, shape index: {}]   ;;  %s834_s0 = inlined_call_operand.vmem [shape: f32[32,16], index: 0, kind: input, shape index: {}]   ;;  %s835_s3 = inlined_call_operand.vmem [shape: f32[1,128], index: 3, kind: input, shape index: {}]   ;;  %s836_s4 = inlined_call_operand.vmem [shape: f32[32,1], index: 4, kind: input, shape index: {}]   ;;  %s837_s5 = inlined_call_operand.<no memory space> [shape: f32[1,1], index: 5, kind: input, shape index: {}]   ;;  %s838_s6 = inlined_call_operand.vmem [shape: f32[4,1], index: 6, kind: output, shape index: {}]  }
   0x1   :  { %v32_v0 = vld [vmem:[%s832_s1] sm:$0xff]  ;;  %v33_v1 = vld [vmem:[%s832_s1 + $0x8] sm:$0xff]  ;;  %v67_v2 = vld [vmem:[%s833_s2 + $0x10] sm:$0xff] }
   0x2   :  { %v34_v3 = vpack.c.bf16 %v33_v1, %v32_v0  ;;  %v68_v4 = vld [vmem:[%s833_s2 + $0x18] sm:$0xff]  ;;  %v26_v5 = vld [vmem:[%s834_s0] sm:$0xff]  ;;  %v27_v6 = vld [vmem:[%s834_s0 + $0x8] sm:$0xff] }
   0x3   :  { %v70_v7 = vpack.c.bf16 %v68_v4, %v67_v2  ;;  %v30_v8 = vpack.c.bf16 %v27_v6, %v26_v5  ;;  %v65_v9 = vld [vmem:[%s833_s2] sm:$0xff]  ;;  %v66_v10 = vld [vmem:[%s833_s2 + $0x8] sm:$0xff] }
   0x4   :  { %53 = vmatpush.bf16.msra.mxu0 %v34_v3  ;;  %v69_v11 = vpack.c.bf16 %v66_v10, %v65_v9  ;;  %v761_v13 = vld [vmem:[%s835_s3] ss:$0 sm:$0xff]  ;;  %s697_s3 = smov 32  }
   0x5   :  { %81 = vmatpush.bf16.msra.mxu1 %v70_v7  ;;  %139 = vmatpush.bf16.msra.mxu2 %v70_v7 }
   0x6   :  { %204 = vmatpush.bf16.msra.mxu3 %v70_v7 }
   0x7   :  { %608 = vmatmul.msk.bf16.vlgmr.msra.gmra.mxu0 %vm39_vm0, %v30_v8 }
   0x8   :  { %456 = vmatpush.bf16.msrb.mxu0 %v70_v7 }
   0x9   :  { %82 = vmatpush.bf16.msra.mxu1 %v69_v11  ;;  %140 = vmatpush.bf16.msra.mxu2 %v69_v11 }
   0xa   :  { %205 = vmatpush.bf16.msra.mxu3 %v69_v11 }
   0xc   :  { %83 = vmatmul.bf16.vlgmr.msra.gmra.mxu1 %v695_v12  ;;  %457 = vmatpush.bf16.msrb.mxu0 %v69_v11 }
   0xd   :  { %265 = vmatpush.bf16.msrb.mxu1 %v70_v7  ;;  %330 = vmatpush.bf16.msrb.mxu2 %v70_v7 }
   0xe   :  { %391 = vmatpush.bf16.msrb.mxu3 %v70_v7 }
  0x11   :  { %266 = vmatpush.bf16.msrb.mxu1 %v69_v11  ;;  %331 = vmatpush.bf16.msrb.mxu2 %v69_v11 }
  0x12   :  { %392 = vmatpush.bf16.msrb.mxu3 %v69_v11 }
  0x15   :  { %517 = vmatpush.bf16.msra.mxu1 %v70_v7 }
  0x19   :  { %518 = vmatpush.bf16.msra.mxu1 %v69_v11 }
  0x84   :  { %v55_v14 = vpop.f32.mrf.mxu0 }
  0x85   :  { %v56_v15 = vadd.f32 %v761_v13, %v55_v14 }
  0x89   :  { %v84_v16 = vpop.f32.mrf.mxu1 }
  0x8a   :  { %v88_v17 = vadd.f32 %v84_v16, %v56_v15 }
  0x8c   :  { %631 = vtanh.f32 %v88_v17  ;;  %v610_v20 = vmul.f32 -1.442695, %v88_v17  ;;  %v57_v9 = vpop.f32.mrf.mxu0 }
  0x8d   :  { %v58_v10 = vadd.f32 %v761_v13, %v57_v9 }
  0x8e   :  { %633 = vpow2.f32 %v610_v20 }
  0x91   :  { %v86_v18 = vpop.f32.mrf.mxu1 }
  0x92   :  { %v632_v19 = vpop.eup %631 }
  0x93   :  { %111 = vrot.lane.b32.xlu0 %v632_v19, %s696_s13 }
  0x94   :  { %v634_v21 = vpop.eup %633 }
  0x95   :  { %v92_v22 = vadd.f32 1.0, %v634_v21 }
  0x97   :  { %635 = vrcp.f32 %v92_v22  ;;  %v104_v28 = vand.u32 2147483648, %v92_v22  ;;  %vm98_vm2 = vweird.f32 %v92_v22  ;;  %v102_v29 = vand.u32 2147483647, %v92_v22 }
  0x99   :  { %v105_v31 = vor.u32 1.1754944e-38, %v104_v28  ;;  %vm103_vm4 = vcmp.eq.f32.partialorder %v102_v29, 8.507059e+37 }
  0x9d   :  { %v636_v23 = vpop.eup %635 }
  0x9e   :  { %v94_v24 = vmul.f32 %v636_v23, %v92_v22  ;;  %vm99_vm1 = vweird.f32 %v636_v23 }
  0x9f   :  { %vm100_vm3 = vmor %vm98_vm2, %vm99_vm1 }
  0xa0   :  { %v95_v25 = vsub.f32 1.0, %v94_v24 }
  0xa2   :  { %v96_v26 = vmul.f32 %v636_v23, %v95_v25 }
  0xa4   :  { %v97_v27 = vadd.f32 %v636_v23, %v96_v26 }
  0xa6   :  { %v101_v30 = vsel %vm100_vm3, %v636_v23, %v97_v27 }
  0xa7   :  { %v106_v33 = vsel %vm103_vm4, %v105_v31, %v101_v30 }
  0xa8   :  { %v109_v35 = vmul.f32 0.0, %v106_v33 }
 0x105   :  { %v112_v32 = vpop.permute.xlu0 %111 }
 0x106   :  { %v114_v34 = vmul.f32 %v112_v32, %v106_v33 }
 0x108   :  { %116 = vrot.lane.b32.xlu0 %v114_v34, %s697_s3 }
 0x17a   :  { %v117_v36 = vpop.permute.xlu0 %116 }
 0x17b   :  { %v119_v37 = vadd.f32 %v117_v36, %v109_v35 }
 0x17d   :  { %637 = vtanh.f32 %v119_v37  ;;  %v171_v63 = vrot.slane %v119_v37, 4 }
 0x183   :  { %v638_v38 = vpop.eup %637 }
 0x184   :  { %122 = vrot.lane.b32.xlu1 %v638_v38, %s696_s13 }
 0x1f6   :  { %v123_v39 = vpop.permute.xlu1 %122 }
 0x1f7   :  { %v125_v40 = vmul.f32 %v123_v39, %v106_v33 }
 0x1f9   :  { %v126_v41 = vpack.c.bf16 %v125_v40, %v125_v40 }
 0x1fb   :  { %128 = vrot.lane.b32.xlu1 %v126_v41, %s697_s3 }
 0x26d   :  { %v129_v42 = vpop.permute.xlu1 %128 }
 0x26e   :  { %611 = vmatmul.msk.bf16.vlgmr.msra.gmra.mxu2 %vm71_vm5, %v129_v42 }
 0x2f1   :  { %v142_v43 = vpop.f32.mrf.mxu2 }
 0x2f2   :  { %v147_v44 = vrot.slane %v142_v43, 4 }
 0x2f4   :  { %v149_v45 = vadd.f32 %v147_v44, %v56_v15 }
 0x2f6   :  { %639 = vtanh.f32 %v149_v45  ;;  %v612_v48 = vmul.f32 -1.442695, %v149_v45 }
 0x2f8   :  { %641 = vpow2.f32 %v612_v48 }
 0x2f9   :  { %v144_v46 = vpop.f32.mrf.mxu2 }
 0x2fc   :  { %v640_v47 = vpop.eup %639 }
 0x2fd   :  { %175 = vrot.lane.b32.xlu2 %v640_v47, %s696_s13 }
 0x2fe   :  { %v642_v49 = vpop.eup %641 }
 0x2ff   :  { %v153_v50 = vadd.f32 1.0, %v642_v49 }
 0x301   :  { %643 = vrcp.f32 %v153_v50  ;;  %v165_v56 = vand.u32 2147483648, %v153_v50  ;;  %vm159_vm7 = vweird.f32 %v153_v50  ;;  %v163_v57 = vand.u32 2147483647, %v153_v50 }
 0x303   :  { %v166_v59 = vor.u32 1.1754944e-38, %v165_v56  ;;  %vm164_vm9 = vcmp.eq.f32.partialorder %v163_v57, 8.507059e+37 }
 0x307   :  { %v644_v51 = vpop.eup %643 }
 0x308   :  { %v155_v52 = vmul.f32 %v644_v51, %v153_v50  ;;  %vm160_vm6 = vweird.f32 %v644_v51 }
 0x309   :  { %vm161_vm8 = vmor %vm159_vm7, %vm160_vm6 }
 0x30a   :  { %v156_v53 = vsub.f32 1.0, %v155_v52 }
 0x30c   :  { %v157_v54 = vmul.f32 %v644_v51, %v156_v53 }
 0x30e   :  { %v158_v55 = vadd.f32 %v644_v51, %v157_v54 }
 0x310   :  { %v162_v58 = vsel %vm161_vm8, %v644_v51, %v158_v55 }
 0x311   :  { %v167_v61 = vsel %vm164_vm9, %v166_v59, %v162_v58 }
 0x312   :  { %v173_v0 = vmul.f32 %v171_v63, %v167_v61 }
 0x357   :  { %v176_v60 = vpop.permute.xlu2 %175 }
 0x358   :  { %v178_v62 = vmul.f32 %v176_v60, %v167_v61 }
 0x35a   :  { %180 = vrot.lane.b32.xlu2 %v178_v62, %s697_s3 }
 0x3b4   :  { %v181_v1 = vpop.permute.xlu2 %180 }
 0x3b5   :  { %v183_v2 = vadd.f32 %v181_v1, %v173_v0  ;;  %v28_v1 = vld [vmem:[%s834_s0 + $0x10] sm:$0xff] }
 0x3b7   :  { %645 = vtanh.f32 %v183_v2  ;;  %v233_v31 = vrot.slane %v183_v2, 4  ;;  %v29_v2 = vld [vmem:[%s834_s0 + $0x18] sm:$0xff] }
 0x3bd   :  { %v646_v3 = vpop.eup %645 }
 0x3be   :  { %186 = vrot.lane.b32.xlu0 %v646_v3, %s696_s13  ;;  %v31_v3 = vpack.c.bf16 %v29_v2, %v28_v1 }
 0x3c0   :  { %609 = vmatmul.msk.bf16.gmra.mxu0 %vm39_vm0, %v31_v3 }
 0x430   :  { %v187_v4 = vpop.permute.xlu0 %186 }
 0x431   :  { %v189_v5 = vmul.f32 %v187_v4, %v167_v61 }
 0x433   :  { %v190_v6 = vpack.c.bf16 %v189_v5, %v189_v5 }
 0x435   :  { %v192_v7 = vrot.slane %v190_v6, 2 }
 0x437   :  { %193 = vrot.lane.b32.xlu1 %v192_v7, %s697_s3 }
 0x43d   :  { %v60_v9 = vpop.f32.mrf.mxu0 }
 0x4a9   :  { %v194_v8 = vpop.permute.xlu1 %193 }
 0x4aa   :  { %613 = vmatmul.msk.bf16.vlgmr.msra.gmra.mxu3 %vm71_vm5, %v194_v8 }
 0x52d   :  { %v207_v11 = vpop.f32.mrf.mxu3 }
 0x52e   :  { %v211_v12 = vadd.f32 %v207_v11, %v58_v10 }
 0x530   :  { %647 = vtanh.f32 %v211_v12  ;;  %v614_v16 = vmul.f32 -1.442695, %v211_v12 }
 0x532   :  { %649 = vpow2.f32 %v614_v16 }
 0x535   :  { %v209_v14 = vpop.f32.mrf.mxu3 }
 0x536   :  { %v648_v15 = vpop.eup %647 }
 0x537   :  { %237 = vrot.lane.b32.xlu2 %v648_v15, %s696_s13 }
 0x538   :  { %v650_v17 = vpop.eup %649 }
 0x539   :  { %v215_v18 = vadd.f32 1.0, %v650_v17 }
 0x53b   :  { %651 = vrcp.f32 %v215_v18  ;;  %v227_v24 = vand.u32 2147483648, %v215_v18  ;;  %vm221_vm11 = vweird.f32 %v215_v18  ;;  %v225_v25 = vand.u32 2147483647, %v215_v18 }
 0x53d   :  { %v228_v27 = vor.u32 1.1754944e-38, %v227_v24  ;;  %vm226_vm13 = vcmp.eq.f32.partialorder %v225_v25, 8.507059e+37 }
 0x541   :  { %v652_v19 = vpop.eup %651 }
 0x542   :  { %v217_v20 = vmul.f32 %v652_v19, %v215_v18  ;;  %vm222_vm10 = vweird.f32 %v652_v19 }
 0x543   :  { %vm223_vm12 = vmor %vm221_vm11, %vm222_vm10 }
 0x544   :  { %v218_v21 = vsub.f32 1.0, %v217_v20 }
 0x546   :  { %v219_v22 = vmul.f32 %v652_v19, %v218_v21 }
 0x548   :  { %v220_v23 = vadd.f32 %v652_v19, %v219_v22 }
 0x54a   :  { %v224_v26 = vsel %vm223_vm12, %v652_v19, %v220_v23 }
 0x54b   :  { %v229_v29 = vsel %vm226_vm13, %v228_v27, %v224_v26 }
 0x54c   :  { %v235_v32 = vmul.f32 %v233_v31, %v229_v29 }
 0x591   :  { %v238_v28 = vpop.permute.xlu2 %237 }
 0x592   :  { %v240_v30 = vmul.f32 %v238_v28, %v229_v29 }
 0x594   :  { %242 = vrot.lane.b32.xlu0 %v240_v30, %s697_s3 }
 0x606   :  { %v243_v33 = vpop.permute.xlu0 %242 }
 0x607   :  { %v245_v34 = vadd.f32 %v243_v33, %v235_v32 }
 0x609   :  { %653 = vtanh.f32 %v245_v34  ;;  %v297_v60 = vrot.slane %v245_v34, 4 }
 0x60f   :  { %v654_v35 = vpop.eup %653 }
 0x610   :  { %248 = vrot.lane.b32.xlu1 %v654_v35, %s696_s13 }
 0x682   :  { %v249_v36 = vpop.permute.xlu1 %248 }
 0x683   :  { %v251_v37 = vmul.f32 %v249_v36, %v229_v29 }
 0x685   :  { %v252_v38 = vpack.c.bf16 %v251_v37, %v251_v37 }
 0x687   :  { %254 = vrot.lane.b32.xlu2 %v252_v38, %s697_s3 }
 0x6e1   :  { %v255_v39 = vpop.permute.xlu2 %254 }
 0x6e2   :  { %615 = vmatmul.msk.bf16.vlgmr.msrb.gmra.mxu1 %vm71_vm5, %v255_v39 }
 0x75f   :  { %v268_v40 = vpop.f32.mrf.mxu1 }
 0x760   :  { %v273_v41 = vrot.slane %v268_v40, 4 }
 0x762   :  { %v275_v42 = vadd.f32 %v273_v41, %v58_v10  ;;  %v61_v10 = vadd.f32 %v761_v13, %v60_v9 }
 0x764   :  { %655 = vtanh.f32 %v275_v42  ;;  %v616_v45 = vmul.f32 -1.442695, %v275_v42 }
 0x766   :  { %657 = vpow2.f32 %v616_v45 }
 0x767   :  { %v270_v43 = vpop.f32.mrf.mxu1 }
 0x76a   :  { %v656_v44 = vpop.eup %655 }
 0x76b   :  { %301 = vrot.lane.b32.xlu0 %v656_v44, %s696_s13 }
 0x76c   :  { %v658_v46 = vpop.eup %657 }
 0x76d   :  { %v279_v47 = vadd.f32 1.0, %v658_v46 }
 0x76f   :  { %659 = vrcp.f32 %v279_v47  ;;  %v291_v53 = vand.u32 2147483648, %v279_v47  ;;  %vm285_vm15 = vweird.f32 %v279_v47  ;;  %v289_v54 = vand.u32 2147483647, %v279_v47 }
 0x771   :  { %v292_v56 = vor.u32 1.1754944e-38, %v291_v53  ;;  %vm290_vm2 = vcmp.eq.f32.partialorder %v289_v54, 8.507059e+37 }
 0x775   :  { %v660_v48 = vpop.eup %659 }
 0x776   :  { %v281_v49 = vmul.f32 %v660_v48, %v279_v47  ;;  %vm286_vm14 = vweird.f32 %v660_v48 }
 0x777   :  { %vm287_vm1 = vmor %vm285_vm15, %vm286_vm14 }
 0x778   :  { %v282_v50 = vsub.f32 1.0, %v281_v49 }
 0x77a   :  { %v283_v51 = vmul.f32 %v660_v48, %v282_v50 }
 0x77c   :  { %v284_v52 = vadd.f32 %v660_v48, %v283_v51 }
 0x77e   :  { %v288_v55 = vsel %vm287_vm1, %v660_v48, %v284_v52 }
 0x77f   :  { %v293_v58 = vsel %vm290_vm2, %v292_v56, %v288_v55 }
 0x780   :  { %v299_v61 = vmul.f32 %v297_v60, %v293_v58 }
 0x7dd   :  { %v302_v57 = vpop.permute.xlu0 %301 }
 0x7de   :  { %v304_v59 = vmul.f32 %v302_v57, %v293_v58 }
 0x7e0   :  { %306 = vrot.lane.b32.xlu1 %v304_v59, %s697_s3 }
 0x852   :  { %v307_v62 = vpop.permute.xlu1 %306 }
 0x853   :  { %v309_v63 = vadd.f32 %v307_v62, %v299_v61 }
 0x855   :  { %661 = vtanh.f32 %v309_v63  ;;  %v359_v31 = vrot.slane %v309_v63, 4 }
 0x85b   :  { %v662_v0 = vpop.eup %661 }
 0x85c   :  { %312 = vrot.lane.b32.xlu2 %v662_v0, %s696_s13 }
 0x8b6   :  { %v313_v4 = vpop.permute.xlu2 %312 }
 0x8b7   :  { %v315_v5 = vmul.f32 %v313_v4, %v293_v58 }
 0x8b9   :  { %v316_v6 = vpack.c.bf16 %v315_v5, %v315_v5 }
 0x8bb   :  { %v318_v7 = vrot.slane %v316_v6, 2  ;;  %v62_v6 = vpop.f32.mrf.mxu0 }
 0x8bd   :  { %319 = vrot.lane.b32.xlu0 %v318_v7, %s697_s3  ;;  %v63_v7 = vadd.f32 %v761_v13, %v62_v6 }
 0x92f   :  { %v320_v8 = vpop.permute.xlu0 %319 }
 0x930   :  { %617 = vmatmul.msk.bf16.vlgmr.msrb.gmra.mxu2 %vm71_vm5, %v320_v8 }
 0x9b3   :  { %v333_v11 = vpop.f32.mrf.mxu2 }
 0x9b4   :  { %v337_v12 = vadd.f32 %v333_v11, %v61_v10 }
 0x9b6   :  { %663 = vtanh.f32 %v337_v12  ;;  %v618_v16 = vmul.f32 -1.442695, %v337_v12 }
 0x9b8   :  { %665 = vpow2.f32 %v618_v16 }
 0x9bb   :  { %v335_v14 = vpop.f32.mrf.mxu2 }
 0x9bc   :  { %v664_v15 = vpop.eup %663 }
 0x9bd   :  { %363 = vrot.lane.b32.xlu1 %v664_v15, %s696_s13 }
 0x9be   :  { %v666_v17 = vpop.eup %665 }
 0x9bf   :  { %v341_v18 = vadd.f32 1.0, %v666_v17 }
 0x9c1   :  { %667 = vrcp.f32 %v341_v18  ;;  %v353_v24 = vand.u32 2147483648, %v341_v18  ;;  %vm347_vm3 = vweird.f32 %v341_v18  ;;  %v351_v25 = vand.u32 2147483647, %v341_v18 }
 0x9c3   :  { %v354_v27 = vor.u32 1.1754944e-38, %v353_v24  ;;  %vm352_vm6 = vcmp.eq.f32.partialorder %v351_v25, 8.507059e+37 }
 0x9c7   :  { %v668_v19 = vpop.eup %667 }
 0x9c8   :  { %v343_v20 = vmul.f32 %v668_v19, %v341_v18  ;;  %vm348_vm0 = vweird.f32 %v668_v19 }
 0x9c9   :  { %vm349_vm4 = vmor %vm347_vm3, %vm348_vm0  ;;  %vm602_vm3 = vcmask 3072  }
 0x9ca   :  { %v344_v21 = vsub.f32 1.0, %v343_v20 }
 0x9cc   :  { %v345_v22 = vmul.f32 %v668_v19, %v344_v21 }
 0x9ce   :  { %v346_v23 = vadd.f32 %v668_v19, %v345_v22 }
 0x9d0   :  { %v350_v26 = vsel %vm349_vm4, %v668_v19, %v346_v23 }
 0x9d1   :  { %v355_v29 = vsel %vm352_vm6, %v354_v27, %v350_v26 }
 0x9d2   :  { %v361_v32 = vmul.f32 %v359_v31, %v355_v29 }
 0xa2f   :  { %v364_v28 = vpop.permute.xlu1 %363 }
 0xa30   :  { %v366_v30 = vmul.f32 %v364_v28, %v355_v29 }
 0xa32   :  { %368 = vrot.lane.b32.xlu2 %v366_v30, %s697_s3 }
 0xa8c   :  { %v369_v33 = vpop.permute.xlu2 %368 }
 0xa8d   :  { %v371_v34 = vadd.f32 %v369_v33, %v361_v32 }
 0xa8f   :  { %669 = vtanh.f32 %v371_v34  ;;  %v423_v60 = vrot.slane %v371_v34, 4 }
 0xa95   :  { %v670_v35 = vpop.eup %669 }
 0xa96   :  { %374 = vrot.lane.b32.xlu0 %v670_v35, %s696_s13 }
 0xb08   :  { %v375_v36 = vpop.permute.xlu0 %374 }
 0xb09   :  { %v377_v37 = vmul.f32 %v375_v36, %v355_v29 }
 0xb0b   :  { %v378_v38 = vpack.c.bf16 %v377_v37, %v377_v37 }
 0xb0d   :  { %380 = vrot.lane.b32.xlu1 %v378_v38, %s697_s3 }
 0xb7f   :  { %v381_v39 = vpop.permute.xlu1 %380 }
 0xb80   :  { %619 = vmatmul.msk.bf16.vlgmr.msrb.gmra.mxu3 %vm71_vm5, %v381_v39 }
 0xc03   :  { %v394_v40 = vpop.f32.mrf.mxu3 }
 0xc04   :  { %v399_v41 = vrot.slane %v394_v40, 4 }
 0xc06   :  { %v401_v42 = vadd.f32 %v399_v41, %v61_v10 }
 0xc08   :  { %671 = vtanh.f32 %v401_v42  ;;  %v620_v45 = vmul.f32 -1.442695, %v401_v42 }
 0xc0a   :  { %673 = vpow2.f32 %v620_v45 }
 0xc0b   :  { %v396_v43 = vpop.f32.mrf.mxu3 }
 0xc0e   :  { %v672_v44 = vpop.eup %671 }
 0xc0f   :  { %427 = vrot.lane.b32.xlu2 %v672_v44, %s696_s13 }
 0xc10   :  { %v674_v46 = vpop.eup %673 }
 0xc11   :  { %v405_v47 = vadd.f32 1.0, %v674_v46 }
 0xc13   :  { %675 = vrcp.f32 %v405_v47  ;;  %v417_v53 = vand.u32 2147483648, %v405_v47  ;;  %vm411_vm8 = vweird.f32 %v405_v47  ;;  %v415_v54 = vand.u32 2147483647, %v405_v47 }
 0xc15   :  { %v418_v56 = vor.u32 1.1754944e-38, %v417_v53  ;;  %vm416_vm10 = vcmp.eq.f32.partialorder %v415_v54, 8.507059e+37 }
 0xc19   :  { %v676_v48 = vpop.eup %675 }
 0xc1a   :  { %v407_v49 = vmul.f32 %v676_v48, %v405_v47  ;;  %vm412_vm7 = vweird.f32 %v676_v48 }
 0xc1b   :  { %vm413_vm9 = vmor %vm411_vm8, %vm412_vm7 }
 0xc1c   :  { %v408_v50 = vsub.f32 1.0, %v407_v49 }
 0xc1e   :  { %v409_v51 = vmul.f32 %v676_v48, %v408_v50 }
 0xc20   :  { %v410_v52 = vadd.f32 %v676_v48, %v409_v51 }
 0xc22   :  { %v414_v55 = vsel %vm413_vm9, %v676_v48, %v410_v52 }
 0xc23   :  { %v419_v58 = vsel %vm416_vm10, %v418_v56, %v414_v55 }
 0xc24   :  { %v425_v61 = vmul.f32 %v423_v60, %v419_v58 }
 0xc69   :  { %v428_v57 = vpop.permute.xlu2 %427 }
 0xc6a   :  { %v430_v59 = vmul.f32 %v428_v57, %v419_v58 }
 0xc6c   :  { %432 = vrot.lane.b32.xlu0 %v430_v59, %s697_s3 }
 0xcde   :  { %v433_v62 = vpop.permute.xlu0 %432 }
 0xcdf   :  { %v435_v63 = vadd.f32 %v433_v62, %v425_v61  ;;  %v571_v61 = vld [vmem:[%s836_s4 + $0x18] sm:$0xff]  ;;  %v570_v62 = vld [vmem:[%s836_s4 + $0x10] sm:$0xff] }
 0xce0   :  { %594 = vmatpush.msra.mxu2 %v571_v61 }
 0xce1   :  { %677 = vtanh.f32 %v435_v63  ;;  %v485_v27 = vrot.slane %v435_v63, 4  ;;  %v569_v63 = vld [vmem:[%s836_s4 + $0x8] sm:$0xff] }
 0xce2   :  { %595 = vmatpush.msra.mxu2 %v570_v62 }
 0xce4   :  { %596 = vmatpush.msra.mxu2 %v569_v63 }
 0xce7   :  { %v678_v0 = vpop.eup %677 }
 0xce8   :  { %438 = vrot.lane.b32.xlu1 %v678_v0, %s696_s13  ;;  %v568_v0 = vld [vmem:[%s836_s4] sm:$0xff] }
 0xce9   :  { %597 = vmatpush.msra.mxu2 %v568_v0 }
 0xd5a   :  { %v439_v1 = vpop.permute.xlu1 %438 }
 0xd5b   :  { %v441_v2 = vmul.f32 %v439_v1, %v419_v58 }
 0xd5d   :  { %v442_v3 = vpack.c.bf16 %v441_v2, %v441_v2 }
 0xd5f   :  { %v444_v4 = vrot.slane %v442_v3, 2 }
 0xd61   :  { %445 = vrot.lane.b32.xlu2 %v444_v4, %s697_s3  ;;  %v11_v4 = vstv %s837_s5 }
 0xd62   :  { %12 = vst [vmem:[#allocation2] sm:$0x1] %v11_v4 }
 0xd69   :  { %v630_v6 = vld [vmem:[#allocation2] ss:$0 sm:$0xff] }
 0xdbb   :  { %v446_v5 = vpop.permute.xlu2 %445 }
 0xdbc   :  { %621 = vmatmul.msk.bf16.vlgmr.msrb.gmra.mxu0 %vm71_vm5, %v446_v5 }
 0xe39   :  { %v459_v8 = vpop.f32.mrf.mxu0 }
 0xe3a   :  { %v463_v9 = vadd.f32 %v459_v8, %v63_v7 }
 0xe3c   :  { %679 = vtanh.f32 %v463_v9  ;;  %v622_v12 = vmul.f32 -1.442695, %v463_v9 }
 0xe3e   :  { %681 = vpow2.f32 %v622_v12 }
 0xe41   :  { %v461_v10 = vpop.f32.mrf.mxu0 }
 0xe42   :  { %v680_v11 = vpop.eup %679 }
 0xe43   :  { %489 = vrot.lane.b32.xlu0 %v680_v11, %s696_s13 }
 0xe44   :  { %v682_v14 = vpop.eup %681 }
 0xe45   :  { %v467_v15 = vadd.f32 1.0, %v682_v14 }
 0xe47   :  { %683 = vrcp.f32 %v467_v15  ;;  %v479_v21 = vand.u32 2147483648, %v467_v15  ;;  %vm473_vm12 = vweird.f32 %v467_v15  ;;  %v477_v13 = vand.u32 2147483647, %v467_v15 }
 0xe49   :  { %v480_v23 = vor.u32 1.1754944e-38, %v479_v21  ;;  %vm478_vm14 = vcmp.eq.f32.partialorder %v477_v13, 8.507059e+37 }
 0xe4d   :  { %v684_v16 = vpop.eup %683 }
 0xe4e   :  { %v469_v17 = vmul.f32 %v684_v16, %v467_v15  ;;  %vm474_vm11 = vweird.f32 %v684_v16 }
 0xe4f   :  { %vm475_vm13 = vmor %vm473_vm12, %vm474_vm11 }
 0xe50   :  { %v470_v18 = vsub.f32 1.0, %v469_v17 }
 0xe52   :  { %v471_v19 = vmul.f32 %v684_v16, %v470_v18 }
 0xe54   :  { %v472_v20 = vadd.f32 %v684_v16, %v471_v19 }
 0xe56   :  { %v476_v22 = vsel %vm475_vm13, %v684_v16, %v472_v20 }
 0xe57   :  { %v481_v25 = vsel %vm478_vm14, %v480_v23, %v476_v22 }
 0xe58   :  { %v487_v28 = vmul.f32 %v485_v27, %v481_v25 }
 0xeb5   :  { %v490_v24 = vpop.permute.xlu0 %489 }
 0xeb6   :  { %v492_v26 = vmul.f32 %v490_v24, %v481_v25 }
 0xeb8   :  { %494 = vrot.lane.b32.xlu1 %v492_v26, %s697_s3 }
 0xf2a   :  { %v495_v29 = vpop.permute.xlu1 %494 }
 0xf2b   :  { %v497_v30 = vadd.f32 %v495_v29, %v487_v28 }
 0xf2d   :  { %685 = vtanh.f32 %v497_v30  ;;  %v549_v56 = vrot.slane %v497_v30, 4 }
 0xf33   :  { %v686_v31 = vpop.eup %685 }
 0xf34   :  { %500 = vrot.lane.b32.xlu2 %v686_v31, %s696_s13 }
 0xf8e   :  { %v501_v32 = vpop.permute.xlu2 %500 }
 0xf8f   :  { %v503_v33 = vmul.f32 %v501_v32, %v481_v25 }
 0xf91   :  { %v504_v34 = vpack.c.bf16 %v503_v33, %v503_v33 }
 0xf93   :  { %506 = vrot.lane.b32.xlu0 %v504_v34, %s697_s3 }
0x1005   :  { %v507_v35 = vpop.permute.xlu0 %506 }
0x1006   :  { %623 = vmatmul.msk.bf16.vlgmr.msra.gmra.mxu1 %vm71_vm5, %v507_v35 }
0x1083   :  { %v520_v36 = vpop.f32.mrf.mxu1 }
0x1084   :  { %v525_v37 = vrot.slane %v520_v36, 4 }
0x1086   :  { %v527_v38 = vadd.f32 %v525_v37, %v63_v7 }
0x1088   :  { %687 = vtanh.f32 %v527_v38  ;;  %v624_v41 = vmul.f32 -1.442695, %v527_v38 }
0x108a   :  { %689 = vpow2.f32 %v624_v41 }
0x108b   :  { %v522_v39 = vpop.f32.mrf.mxu1 }
0x108e   :  { %v688_v40 = vpop.eup %687 }
0x108f   :  { %553 = vrot.lane.b32.xlu1 %v688_v40, %s696_s13 }
0x1090   :  { %v690_v42 = vpop.eup %689 }
0x1091   :  { %v531_v43 = vadd.f32 1.0, %v690_v42 }
0x1093   :  { %691 = vrcp.f32 %v531_v43  ;;  %v543_v49 = vand.u32 2147483648, %v531_v43  ;;  %vm537_vm1 = vweird.f32 %v531_v43  ;;  %v541_v50 = vand.u32 2147483647, %v531_v43 }
0x1095   :  { %v544_v52 = vor.u32 1.1754944e-38, %v543_v49  ;;  %vm542_vm0 = vcmp.eq.f32.partialorder %v541_v50, 8.507059e+37 }
0x1099   :  { %v692_v44 = vpop.eup %691 }
0x109a   :  { %v533_v45 = vmul.f32 %v692_v44, %v531_v43  ;;  %vm538_vm15 = vweird.f32 %v692_v44 }
0x109b   :  { %vm539_vm2 = vmor %vm537_vm1, %vm538_vm15 }
0x109c   :  { %v534_v46 = vsub.f32 1.0, %v533_v45 }
0x109e   :  { %v535_v47 = vmul.f32 %v692_v44, %v534_v46 }
0x10a0   :  { %v536_v48 = vadd.f32 %v692_v44, %v535_v47 }
0x10a2   :  { %v540_v51 = vsel %vm539_vm2, %v692_v44, %v536_v48 }
0x10a3   :  { %v545_v54 = vsel %vm542_vm0, %v544_v52, %v540_v51 }
0x10a4   :  { %v551_v57 = vmul.f32 %v549_v56, %v545_v54 }
0x1101   :  { %v554_v53 = vpop.permute.xlu1 %553 }
0x1102   :  { %v556_v55 = vmul.f32 %v554_v53, %v545_v54 }
0x1104   :  { %558 = vrot.lane.b32.xlu2 %v556_v55, %s697_s3 }
0x115e   :  { %v559_v58 = vpop.permute.xlu2 %558 }
0x115f   :  { %v561_v59 = vadd.f32 %v559_v58, %v551_v57 }
0x1161   :  { %693 = vtanh.f32 %v561_v59 }
0x1167   :  { %v694_v60 = vpop.eup %693 }
0x1168   :  { %564 = vrot.lane.b32.xlu0 %v694_v60, %s696_s13 }
0x11da   :  { %v565_v1 = vpop.permute.xlu0 %564 }
0x11db   :  { %v567_v2 = vmul.f32 %v565_v1, %v545_v54 }
0x11dd   :  { %v577_v3 = vrot.slane %v567_v2, 4 }
0x11df   :  { %578 = vrot.lane.b32.xlu1 %v577_v3, %s697_s3 }
0x1251   :  { %v579_v5 = vpop.permute.xlu1 %578 }
0x1252   :  { %625 = vmatmul.msk.f32.vlgmr.msra.gmra.mxu2 %vm71_vm5, %v579_v5 }
0x12d5   :  { %v599_v7 = vpop.f32.mrf.mxu2 }
0x12d6   :  { %v600_v8 = vadd.f32 %v630_v6, %v599_v7 }
0x12d8   :  { %603 = vst.msk [vmem:[%s838_s6] sm:$0xf] %vm602_vm3, %v600_v8 }

</bundles_post_ra>
